<compile_context>
chip_gen: v7x
topology: tpu7x:2x2x1
jax: 0.10.0
libtpu: 0.0.40
codegen_flags: <defaults>
</compile_context>

<pallas_src>
import jax
import jax.numpy as jnp
from jax.experimental import pallas as pl
from jax.experimental.pallas import tpu as pltpu

P_DROP = 0.8                                  # F.dropout(x, p=0.8), training=True default
_KEEP_THRESHOLD = int(P_DROP * (1 << 24))     # integer threshold on 24-bit uniforms


def _round_up(n, m):
    return ((n + m - 1) // m) * m


def _splitmix32(h):
    """Counter-based hash -> 32 uniform bits (uint32). VPU-only integer ops."""
    h = h ^ (h >> 16)
    h = h * jnp.uint32(0x7FEB352D)
    h = h ^ (h >> 15)
    h = h * jnp.uint32(0x846CA68B)
    h = h ^ (h >> 16)
    return h


def earthquake_mlp_kernel(seed_ref,                       # scalar prefetch (SMEM)
                          x_ref, w1_ref, b1_ref,
                          w2_ref, b2_ref, w3_ref, b3_ref,
                          o_ref):
    tb, d = x_ref.shape
    x = x_ref[...]                                        # (TB, D) f32

    # ---- dropout(p=0.8) ----
    # Hash keyed on (seed, global element index): reproducible, distinct per
    # batch tile (global row offset includes pl.program_id), and lowers on both
    # Mosaic TPU and the interpreter. The 1/(1-p) scale is folded into w1.
    row = jax.lax.broadcasted_iota(jnp.int32, (tb, d), 0).astype(jnp.uint32)
    col = jax.lax.broadcasted_iota(jnp.int32, (tb, d), 1).astype(jnp.uint32)
    row_off = (pl.program_id(0) * tb).astype(jnp.uint32)
    idx = (row + row_off) * jnp.uint32(d) + col
    bits = _splitmix32(idx + seed_ref[0].astype(jnp.uint32))
    keep = (bits >> 8) >= jnp.uint32(_KEEP_THRESHOLD)     # P(keep) = 1 - P_DROP
    x = jnp.where(keep, x, 0.0).astype(jnp.bfloat16)

    # ---- fc1 + relu (bf16 MXU inputs, f32 accumulation; w1 pre-scaled by 5) ----
    h1 = jnp.dot(x, w1_ref[...], preferred_element_type=jnp.float32) + b1_ref[...]
    h1 = jnp.maximum(h1, 0.0).astype(jnp.bfloat16)

    # ---- fc2 + relu ----
    h2 = jnp.dot(h1, w2_ref[...], preferred_element_type=jnp.float32) + b2_ref[...]
    h2 = jnp.maximum(h2, 0.0).astype(jnp.bfloat16)

    # ---- fc3 ----
    # Contract over H with the batch dim landing on lanes: the per-tile result
    # is a lane-dense (1, TB) row instead of an N=1 lane-width-1 column.
    y = jax.lax.dot_general(w3_ref[...], h2,
                            dimension_numbers=(((1,), (1,)), ((), ())),
                            preferred_element_type=jnp.float32)    # (1, TB)
    o_ref[...] = (y + b3_ref[...]).astype(o_ref.dtype)


def earthquake_nn(x, params, seed=0, block_b=512):
    """Forward pass of Earthquake_NN. x: (B, in_num) f32 -> (B,) f32 (squeezed)."""
    w1, b1, w2, b2, w3, b3 = params
    B, D = x.shape
    H = w1.shape[1]                                        # in_num * 4

    # Host-side prep: fold dropout's 1/(1-p) into w1, cast weights to bf16 for
    # the MXU, lay fc3 out as a (1, H) row, keep biases in f32.
    inv_keep = 1.0 / (1.0 - P_DROP)
    w1b = (w1.astype(jnp.float32) * inv_keep).astype(jnp.bfloat16)
    w2b = w2.astype(jnp.bfloat16)
    w3b = w3.reshape(1, H).astype(jnp.bfloat16)
    b1r = b1.reshape(1, H).astype(jnp.float32)
    b2r = b2.reshape(1, H).astype(jnp.float32)
    b3r = b3.reshape(1, 1).astype(jnp.float32)

    # Batch tiling: single tile for small B, otherwise 128-aligned tiles so the
    # lane-dense (1, TB) output blocks stay unmasked. At TB<=512 and typical D/H
    # the double-buffered x tile + resident bf16 weights fit comfortably inside
    # the default scoped-VMEM limit on v5e/v6e/v7x (no vmem_limit_bytes needed).
    B8 = _round_up(B, 8)
    if B8 <= block_b:
        TB = B8                                 # single tile: block == full array
    else:
        TB = _round_up(block_b, 128)            # multi-tile: lane-aligned output blocks
    B_pad = _round_up(B, TB)
    if B_pad != B:
        x = jnp.pad(x, ((0, B_pad - B), (0, 0)))
    num_tiles = B_pad // TB

    seed_arr = jnp.array([seed], dtype=jnp.int32)
    const = lambda shape: pl.BlockSpec(shape, lambda i, seed_r: (0, 0))  # VMEM-resident

    out = pl.pallas_call(
        earthquake_mlp_kernel,
        out_shape=jax.ShapeDtypeStruct((1, B_pad), jnp.float32),
        grid_spec=pltpu.PrefetchScalarGridSpec(
            num_scalar_prefetch=1,
            grid=(num_tiles,),
            in_specs=[
                pl.BlockSpec((TB, D), lambda i, seed_r: (i, 0)),   # x (batch-tiled)
                const((D, H)),                                     # w1 (bf16, pre-scaled)
                const((1, H)),                                     # b1
                const((H, H)),                                     # w2 (bf16)
                const((1, H)),                                     # b2
                const((1, H)),                                     # w3 row (bf16)
                const((1, 1)),                                     # b3
            ],
            out_specs=pl.BlockSpec((1, TB), lambda i, seed_r: (0, i)),
        ),
        compiler_params=pltpu.CompilerParams(
            # Batch tiles are independent -> megacore-shardable on v7x;
            # harmless no-op on v5e/v6e.
            dimension_semantics=("parallel",),
        ),
    )(seed_arr, x, w1b, b1r, w2b, b2r, w3b, b3r)

    return jnp.squeeze(out[0, :B])               # matches x.squeeze() in the PyTorch module


def init_params(key, in_num):
    """Deterministic PyTorch-style (uniform) init. Weights stored as (in, out)."""
    H = in_num * 4
    ks = jax.random.split(key, 6)

    def linear(kw, kb, fan_in, fan_out):
        bound = 1.0 / jnp.sqrt(fan_in)
        w = jax.random.uniform(kw, (fan_in, fan_out), jnp.float32, -bound, bound)
        b = jax.random.uniform(kb, (1, fan_out), jnp.float32, -bound, bound)
        return w, b

    w1, b1 = linear(ks[0], ks[1], in_num, H)
    w2, b2 = linear(ks[2], ks[3], H, H)
    w3, b3 = linear(ks[4], ks[5], H, 1)
    return (w1, b1, w2, b2, w3, b3)


if __name__ == "__main__":
    key = jax.random.PRNGKey(0)
    k_x, k_p = jax.random.split(key)

    B, in_num = 8, 32                 # small shapes; hidden = in_num * 4 = 128
    x = jax.random.normal(k_x, (B, in_num), dtype=jnp.float32)
    params = init_params(k_p, in_num)

    y = earthquake_nn(x, params, seed=123)
    y = jax.block_until_ready(y)
    assert y.shape == (B,)
    print("KERNEL_OK")
</pallas_src>

<mosaic_0001>
module attributes {stable_mosaic.version = 11 : i64} {
  func.func @earthquake_mlp_kernel(%arg0: i32, %arg1: memref<1xi32, #tpu.memory_space<smem>>, %arg2: memref<8x32xf32, #tpu.memory_space<vmem>>, %arg3: memref<32x128xbf16, #tpu.memory_space<vmem>>, %arg4: memref<1x128xf32, #tpu.memory_space<vmem>>, %arg5: memref<128x128xbf16, #tpu.memory_space<vmem>>, %arg6: memref<1x128xf32, #tpu.memory_space<vmem>>, %arg7: memref<1x128xbf16, #tpu.memory_space<vmem>>, %arg8: memref<1x1xf32, #tpu.memory_space<vmem>>, %arg9: memref<1x8xf32, #tpu.memory_space<vmem>>) attributes {dimension_semantics = [#tpu.dimension_semantics<parallel>], iteration_bounds = array<i64: 1>, scalar_prefetch = 1 : i64, scratch_operands = 0 : i64, tpu.core_type = #tpu.core_type<tc>, window_params = [{transform_indices = @transform_0, window_bounds = array<i64: 8, 32>}, {pipeline_mode = #tpu.pipeline_mode<synchronous>, transform_indices = @transform_1, window_bounds = array<i64: 32, 128>}, {pipeline_mode = #tpu.pipeline_mode<synchronous>, transform_indices = @transform_2, window_bounds = array<i64: 1, 128>}, {pipeline_mode = #tpu.pipeline_mode<synchronous>, transform_indices = @transform_3, window_bounds = array<i64: 128, 128>}, {pipeline_mode = #tpu.pipeline_mode<synchronous>, transform_indices = @transform_4, window_bounds = array<i64: 1, 128>}, {pipeline_mode = #tpu.pipeline_mode<synchronous>, transform_indices = @transform_5, window_bounds = array<i64: 1, 128>}, {pipeline_mode = #tpu.pipeline_mode<synchronous>, transform_indices = @transform_6, window_bounds = array<i64: 1, 1>}, {transform_indices = @transform_7, window_bounds = array<i64: 1, 8>}]} {
    %c0 = arith.constant 0 : index
    %c0_0 = arith.constant 0 : index
    %0 = vector.load %arg2[%c0, %c0_0] : memref<8x32xf32, #tpu.memory_space<vmem>>, vector<8x32xf32>
    %1 = tpu.iota {dimensions = array<i32: 0>} : vector<8x32xi32>
    %2 = tpu.iota {dimensions = array<i32: 1>} : vector<8x32xi32>
    %c8_i32 = arith.constant 8 : i32
    %3 = arith.muli %arg0, %c8_i32 : i32
    %4 = vector.broadcast %3 : i32 to vector<8x32xi32>
    %5 = arith.addi %1, %4 : vector<8x32xi32>
    %c32_i32 = arith.constant 32 : i32
    %6 = vector.broadcast %c32_i32 : i32 to vector<8x32xi32>
    %7 = arith.muli %5, %6 : vector<8x32xi32>
    %8 = arith.addi %7, %2 : vector<8x32xi32>
    %c0_1 = arith.constant 0 : index
    %9 = memref.load %arg1[%c0_1] : memref<1xi32, #tpu.memory_space<smem>>
    %10 = vector.broadcast %9 : i32 to vector<8x32xi32>
    %11 = arith.addi %8, %10 : vector<8x32xi32>
    %c16_i32 = arith.constant 16 : i32
    %12 = vector.broadcast %c16_i32 : i32 to vector<8x32xi32>
    %13 = arith.shrui %11, %12 : vector<8x32xi32>
    %14 = arith.xori %11, %13 : vector<8x32xi32>
    %c2146121005_i32 = arith.constant 2146121005 : i32
    %15 = vector.broadcast %c2146121005_i32 : i32 to vector<8x32xi32>
    %16 = arith.muli %14, %15 : vector<8x32xi32>
    %c15_i32 = arith.constant 15 : i32
    %17 = vector.broadcast %c15_i32 : i32 to vector<8x32xi32>
    %18 = arith.shrui %16, %17 : vector<8x32xi32>
    %19 = arith.xori %16, %18 : vector<8x32xi32>
    %c-2073254261_i32 = arith.constant -2073254261 : i32
    %20 = vector.broadcast %c-2073254261_i32 : i32 to vector<8x32xi32>
    %21 = arith.muli %19, %20 : vector<8x32xi32>
    %c16_i32_2 = arith.constant 16 : i32
    %22 = vector.broadcast %c16_i32_2 : i32 to vector<8x32xi32>
    %23 = arith.shrui %21, %22 : vector<8x32xi32>
    %24 = arith.xori %21, %23 : vector<8x32xi32>
    %c8_i32_3 = arith.constant 8 : i32
    %25 = vector.broadcast %c8_i32_3 : i32 to vector<8x32xi32>
    %26 = arith.shrui %24, %25 : vector<8x32xi32>
    %c13421772_i32 = arith.constant 13421772 : i32
    %27 = vector.broadcast %c13421772_i32 : i32 to vector<8x32xi32>
    %28 = arith.cmpi uge, %26, %27 : vector<8x32xi32>
    %cst = arith.constant 0.000000e+00 : f32
    %29 = vector.broadcast %cst : f32 to vector<8x32xf32>
    %30 = arith.select %28, %0, %29 : vector<8x32xi1>, vector<8x32xf32>
    %31 = arith.truncf %30 : vector<8x32xf32> to vector<8x32xbf16>
    %c0_4 = arith.constant 0 : index
    %c0_5 = arith.constant 0 : index
    %32 = vector.load %arg3[%c0_4, %c0_5] : memref<32x128xbf16, #tpu.memory_space<vmem>>, vector<32x128xbf16>
    %cst_6 = arith.constant dense<0.000000e+00> : vector<8x128xf32>
    %33 = tpu.matmul %31, %32, %cst_6 {dimension_numbers = #tpu.dot_dimension_numbers<[1], [0], [0], [1], [0, 0, 1, 1], [], []>} : vector<8x32xbf16>, vector<32x128xbf16>, vector<8x128xf32> -> vector<8x128xf32>
    %c0_7 = arith.constant 0 : index
    %c0_8 = arith.constant 0 : index
    %34 = vector.load %arg4[%c0_7, %c0_8] : memref<1x128xf32, #tpu.memory_space<vmem>>, vector<1x128xf32>
    %35 = vector.broadcast %34 : vector<1x128xf32> to vector<8x128xf32>
    %36 = arith.addf %33, %35 : vector<8x128xf32>
    %cst_9 = arith.constant 0.000000e+00 : f32
    %37 = vector.broadcast %cst_9 : f32 to vector<8x128xf32>
    %38 = arith.maximumf %36, %37 : vector<8x128xf32>
    %39 = arith.truncf %38 : vector<8x128xf32> to vector<8x128xbf16>
    %c0_10 = arith.constant 0 : index
    %c0_11 = arith.constant 0 : index
    %40 = vector.load %arg5[%c0_10, %c0_11] : memref<128x128xbf16, #tpu.memory_space<vmem>>, vector<128x128xbf16>
    %cst_12 = arith.constant dense<0.000000e+00> : vector<8x128xf32>
    %41 = tpu.matmul %39, %40, %cst_12 {dimension_numbers = #tpu.dot_dimension_numbers<[1], [0], [0], [1], [0, 0, 1, 1], [], []>} : vector<8x128xbf16>, vector<128x128xbf16>, vector<8x128xf32> -> vector<8x128xf32>
    %c0_13 = arith.constant 0 : index
    %c0_14 = arith.constant 0 : index
    %42 = vector.load %arg6[%c0_13, %c0_14] : memref<1x128xf32, #tpu.memory_space<vmem>>, vector<1x128xf32>
    %43 = vector.broadcast %42 : vector<1x128xf32> to vector<8x128xf32>
    %44 = arith.addf %41, %43 : vector<8x128xf32>
    %cst_15 = arith.constant 0.000000e+00 : f32
    %45 = vector.broadcast %cst_15 : f32 to vector<8x128xf32>
    %46 = arith.maximumf %44, %45 : vector<8x128xf32>
    %47 = arith.truncf %46 : vector<8x128xf32> to vector<8x128xbf16>
    %c0_16 = arith.constant 0 : index
    %c0_17 = arith.constant 0 : index
    %48 = vector.load %arg7[%c0_16, %c0_17] : memref<1x128xbf16, #tpu.memory_space<vmem>>, vector<1x128xbf16>
    %cst_18 = arith.constant dense<0.000000e+00> : vector<1x8xf32>
    %49 = tpu.matmul %48, %47, %cst_18 {dimension_numbers = #tpu.dot_dimension_numbers<[1], [1], [0], [0], [0, 0, 1, 0], [], []>} : vector<1x128xbf16>, vector<8x128xbf16>, vector<1x8xf32> -> vector<1x8xf32>
    %c0_19 = arith.constant 0 : index
    %c0_20 = arith.constant 0 : index
    %50 = vector.load %arg8[%c0_19, %c0_20] : memref<1x1xf32, #tpu.memory_space<vmem>>, vector<1x1xf32>
    %51 = vector.broadcast %50 : vector<1x1xf32> to vector<1x8xf32>
    %52 = arith.addf %49, %51 : vector<1x8xf32>
    %c0_21 = arith.constant 0 : index
    %c0_22 = arith.constant 0 : index
    %53 = vector.load %arg9[%c0_21, %c0_22] : memref<1x8xf32, #tpu.memory_space<vmem>>, vector<1x8xf32>
    tpu.vector_store %arg9[%c0_21, %c0_22], %52 {strides = array<i32>} : memref<1x8xf32, #tpu.memory_space<vmem>>, vector<1x8xf32>,
    return
  }
  func.func @transform_0(%arg0: i32, %arg1: memref<1xi32, #tpu.memory_space<smem>>) -> (i32, i32) {
    %c0_i32 = arith.constant 0 : i32
    %c0_i32_0 = arith.constant 0 : i32
    return %arg0, %c0_i32 : i32, i32
  }
  func.func @transform_1(%arg0: i32, %arg1: memref<1xi32, #tpu.memory_space<smem>>) -> (i32, i32) {
    %c0_i32 = arith.constant 0 : i32
    %c0_i32_0 = arith.constant 0 : i32
    %c0_i32_1 = arith.constant 0 : i32
    return %c0_i32, %c0_i32_0 : i32, i32
  }
  func.func @transform_2(%arg0: i32, %arg1: memref<1xi32, #tpu.memory_space<smem>>) -> (i32, i32) {
    %c0_i32 = arith.constant 0 : i32
    %c0_i32_0 = arith.constant 0 : i32
    %c0_i32_1 = arith.constant 0 : i32
    return %c0_i32, %c0_i32_0 : i32, i32
  }
  func.func @transform_3(%arg0: i32, %arg1: memref<1xi32, #tpu.memory_space<smem>>) -> (i32, i32) {
    %c0_i32 = arith.constant 0 : i32
    %c0_i32_0 = arith.constant 0 : i32
    %c0_i32_1 = arith.constant 0 : i32
    return %c0_i32, %c0_i32_0 : i32, i32
  }
  func.func @transform_4(%arg0: i32, %arg1: memref<1xi32, #tpu.memory_space<smem>>) -> (i32, i32) {
    %c0_i32 = arith.constant 0 : i32
    %c0_i32_0 = arith.constant 0 : i32
    %c0_i32_1 = arith.constant 0 : i32
    return %c0_i32, %c0_i32_0 : i32, i32
  }
  func.func @transform_5(%arg0: i32, %arg1: memref<1xi32, #tpu.memory_space<smem>>) -> (i32, i32) {
    %c0_i32 = arith.constant 0 : i32
    %c0_i32_0 = arith.constant 0 : i32
    %c0_i32_1 = arith.constant 0 : i32
    return %c0_i32, %c0_i32_0 : i32, i32
  }
  func.func @transform_6(%arg0: i32, %arg1: memref<1xi32, #tpu.memory_space<smem>>) -> (i32, i32) {
    %c0_i32 = arith.constant 0 : i32
    %c0_i32_0 = arith.constant 0 : i32
    %c0_i32_1 = arith.constant 0 : i32
    return %c0_i32, %c0_i32_0 : i32, i32
  }
  func.func @transform_7(%arg0: i32, %arg1: memref<1xi32, #tpu.memory_space<smem>>) -> (i32, i32) {
    %c0_i32 = arith.constant 0 : i32
    %c0_i32_0 = arith.constant 0 : i32
    return %c0_i32, %arg0 : i32, i32
  }
}

</mosaic_0001>

<bundles_post_ra>
// kernel: tpu_custom_call.1
= control target key start
LH: loop header
LB: loop body
LE: loop exit
PB: predicated region body
PF: predicated region fallthrough
CT: control target
= control target key end

     0   :  { %s652_s0 = inlined_call_operand.<no memory space> [shape: s32[1], index: 0, kind: input, shape index: {}]   ;;  %s653_s1 = inlined_call_operand.hbm [shape: f32[8,32], index: 1, kind: input, shape index: {}]   ;;  %s654_s2 = inlined_call_operand.hbm [shape: bf16[32,128], index: 2, kind: input, shape index: {}]   ;;  %s655_s3 = inlined_call_operand.vmem [shape: f32[1,128], index: 3, kind: input, shape index: {}]   ;;  %s656_s4 = inlined_call_operand.hbm [shape: bf16[128,128], index: 4, kind: input, shape index: {}]   ;;  %s657_s5 = inlined_call_operand.vmem [shape: f32[1,128], index: 5, kind: input, shape index: {}]   ;;  %s658_s6 = inlined_call_operand.vmem [shape: bf16[1,128], index: 6, kind: input, shape index: {}]   ;;  %s659_s7 = inlined_call_operand.<no memory space> [shape: f32[1,1], index: 7, kind: input, shape index: {}]   ;;  %s660_s8 = inlined_call_operand.hbm [shape: f32[1,8], index: 8, kind: output, shape index: {}]  }
   0x1   :  { %v14_v0 = vstv %s659_s7 }
   0x2   :  { %15 = vst [vmem:[#allocation4] sm:$0x1] %v14_v0 }
   0x3   :  { %16 = vsyncpa [#allocation6], 0 }
   0x4   :  { %17 = vsyncpa [#allocation9], 0 }
   0x5   :  { %18 = vsyncpa [#allocation7], 0  ;;  %s522_s29 = smov [#allocation8]   ;;  %s428_s11 = scalar_lea.hbm %s654_s2, 256 }
   0x6   :  { %s34_s30 = sshll.u32 %s522_s29, 4  ;;  %p429_p0 = scmp.ne.s32.totalorder %s654_s2, %s428_s11  ;;  %s35_s30 = int_to_ptr.vmem [resolvable:$true] %s34_s30 }
   0x7   :  { %p432_p1 = scmp.lt.u32.totalorder %s428_s11, %s654_s2 }
   0x9   :  { %p434_p2 = pnand %p432_p1, %p429_p0 }
   0xb   :  { %437 = shalt.err (!%p434_p2)
}
   0xc   :  { %s438_s7 = scalar_lea.vmem %s35_s30, 256  ;;  %p443_p4 = scmp.lt.s32.totalorder %s35_s30, %s35_s30 }
   0xd   :  { %p439_p3 = scmp.ne.s32.totalorder %s35_s30, %s438_s7  ;;  %p444_p5 = scmp.lt.s32.totalorder %s438_s7, %s438_s7 }
   0xf   :  { %p445_p6 = por %p444_p5, %p443_p4 }
  0x11   :  { %p446_p7 = pnand %p445_p6, %p439_p3 }
  0x13   :  { %449 = shalt.err (!%p446_p7)
}
  0x14   :  { %s523_s16 = smov 64   ;;  %s524_s17 = smov 4  }
  0x15   :  { %40 = dma.hbm_to_vmem [thread:$0]  %s654_s2, 256, %s35_s30, [#allocation9], %s523_s16, %s523_s16, %s524_s17  }
  0x16   :  { %s525_s20 = smov [#allocation5]   ;;  %s526_s22 = smov [#allocation10]  }
  0x17   :  { %s25_s21 = sshll.u32 %s525_s20, 4  ;;  %s48_s23 = sshll.u32 %s526_s22, 4  ;;  %s26_s21 = int_to_ptr.vmem [resolvable:$true] %s25_s21  ;;  %s49_s23 = int_to_ptr.vmem [resolvable:$true] %s48_s23 }
  0x18   :  { %s450_s26 = scalar_lea.hbm %s653_s1, 128 }
  0x19   :  { %p451_p8 = scmp.ne.s32.totalorder %s653_s1, %s450_s26  ;;  %p454_p9 = scmp.lt.u32.totalorder %s450_s26, %s653_s1 }
  0x1b   :  { %p456_p10 = pnand %p454_p9, %p451_p8 }
  0x1d   :  { %459 = shalt.err (!%p456_p10)
}
  0x1e   :  { %s460_s2 = scalar_lea.vmem %s26_s21, 128  ;;  %p465_p12 = scmp.lt.s32.totalorder %s26_s21, %s26_s21 }
  0x1f   :  { %p461_p11 = scmp.ne.s32.totalorder %s26_s21, %s460_s2  ;;  %p466_p13 = scmp.lt.s32.totalorder %s460_s2, %s460_s2 }
  0x21   :  { %p467_p0 = por %p466_p13, %p465_p12 }
  0x23   :  { %p468_p1 = pnand %p467_p0, %p461_p11 }
  0x25   :  { %471 = shalt.err (!%p468_p1)
}
  0x26   :  { %28 = dma.hbm_to_vmem [thread:$0]  %s653_s1, 128, %s26_s21, [#allocation6]  }
  0x27   :  { %s472_s13 = scalar_lea.hbm %s656_s4, 1024 }
  0x28   :  { %p473_p2 = scmp.ne.s32.totalorder %s656_s4, %s472_s13  ;;  %p476_p3 = scmp.lt.u32.totalorder %s472_s13, %s656_s4 }
  0x2a   :  { %p478_p4 = pnand %p476_p3, %p473_p2 }
  0x2c   :  { %481 = shalt.err (!%p478_p4)
}
  0x2d   :  { %s482_s19 = scalar_lea.vmem %s49_s23, 1024  ;;  %p487_p6 = scmp.lt.s32.totalorder %s49_s23, %s49_s23 }
  0x2e   :  { %p483_p5 = scmp.ne.s32.totalorder %s49_s23, %s482_s19  ;;  %p488_p7 = scmp.lt.s32.totalorder %s482_s19, %s482_s19 }
  0x30   :  { %p489_p8 = por %p488_p7, %p487_p6 }
  0x32   :  { %p490_p9 = pnand %p489_p8, %p483_p5 }
  0x34   :  { %493 = shalt.err (!%p490_p9)
}
  0x35   :  { %54 = dma.hbm_to_vmem [thread:$0]  %s656_s4, 1024, %s49_s23, [#allocation9], %s523_s16, %s523_s16, %s524_s17  }
  0x36   :  { %516 = dma.done.wait [#allocation6], 128  }
  0x37   :  { %517 = vsyncadd [#allocation6], 4294967168 }
  0x38   :  { %518 = dma.done.wait [#allocation9], 1280  }
  0x39   :  { %519 = vsyncadd [#allocation9], 4294966016  ;;  %v72_v1 = vlaneseq  ;;  %v527_v2 = vmov 0.0   ;;  %vm528_vm0 = vmmov 0   ;;  %v82_v6 = vstv %s652_s0  ;;  %v418_v8 = vld [vmem:[#allocation8] sm:$0xff]   ;;  %v419_v10 = vld [vmem:[#allocation8 + $0x8] sm:$0xff]  }
  0x3a   :  { %374 = vmatprep.subr.bf16.mxu0 %v527_v2  ;;  %378 = vmatprep.mubr.msk.bf16.mxu0 %vm528_vm0, %v527_v2  ;;  %v420_v12 = vld [vmem:[#allocation10] sm:$0xff]   ;;  %v421_v14 = vld [vmem:[#allocation10 + $0x8] sm:$0xff]   ;;  %v422_v17 = vld [vmem:[#allocation10 + $0x10] sm:$0xff]   ;;  %vm119_vm2 = vcmask 261120   ;;  %v529_v40 = vmov 0   ;;  %s530_s24 = smov [#allocation11]  }
  0x3b   :  { %v622_v3 = vshrl.u32 %v72_v1, 7  ;;  %v75_v4 = vand.u32 127, %v72_v1  ;;  %382 = vmatprep.subr.bf16.mxu1 %v527_v2  ;;  %398 = vmatprep.mubr.msk.bf16.mxu1 %vm528_vm0, %v527_v2  ;;  %v423_v20 = vld [vmem:[#allocation10 + $0x18] sm:$0xff]   ;;  %v424_v23 = vld [vmem:[#allocation10 + $0x20] sm:$0xff]   ;;  %v71_v24 = vld [vmem:[#allocation5] sm:$0xff]  ;;  %s337_s25 = sshll.u32 %s530_s24, 4  ;;  %s338_s25 = int_to_ptr.vmem [resolvable:$true] %s337_s25 }
  0x3c   :  { %375 = vmatpush3.bf16.msra.mxu0 %v418_v8  ;;  %383 = vmatpush3.bf16.msra.mxu1 %v420_v12  ;;  %v425_v26 = vld [vmem:[#allocation10 + $0x28] sm:$0xff]   ;;  %v426_v29 = vld [vmem:[#allocation10 + $0x30] sm:$0xff]   ;;  %v427_v30 = vld [vmem:[#allocation10 + $0x38] sm:$0xff]   ;;  %vm329_vm3 = vcmask 57344   ;;  %s498_s26 = scalar_lea.vmem %s338_s25, 32  ;;  %p499_p11 = scmp.lt.s32.totalorder %s338_s25, %s338_s25 }
  0x3d   :  { %v79_v5 = vmul.u32 32, %v622_v3  ;;  %376 = vmatprep.subr.bf16.mxu0 %v527_v2  ;;  %384 = vmatprep.subr.bf16.mxu1 %v527_v2  ;;  %v347_v31 = vld [vmem:[%s655_s3] ss:$0 sm:$0xff]  ;;  %v287_v50 = vsub.s32 0, %v622_v3 }
  0x3e   :  { %v279_v39 = vld [vmem:[#allocation4] sm:$0x1]  ;;  %417 = vset.pattern.permute.xlu0 %v529_v40 }
  0x3f   :  { %v80_v7 = vadd.s32 %v79_v5, %v75_v4  ;;  %282 = vperm.xlu0 %417, %v279_v39   ;;  %v351_v41 = vld [vmem:[%s657_s5] ss:$0 sm:$0xff]  ;;  %s494_s5 = scalar_lea.vmem %s338_s25, 16 }
  0x40   :  { %377 = vmatpush3.bf16.msra.mxu0 %v419_v10  ;;  %385 = vmatpush3.bf16.msra.mxu1 %v421_v14  ;;  %v278_v49 = vld [vmem:[%s658_s6] sm:$0x1]  ;;  %p495_p10 = scmp.ne.s32.totalorder %s338_s25, %s494_s5  ;;  %p500_p12 = scmp.lt.s32.totalorder %s498_s26, %s494_s5 }
  0x41   :  { %v83_v9 = vadd.s32 %v82_v6, %v80_v7  ;;  %402 = vmatprep.subr.bf16.mxu0 %v527_v2  ;;  %386 = vmatprep.subr.bf16.mxu1 %v527_v2 }
  0x42   :  { %p501_p13 = por %p500_p12, %p499_p11 }
  0x43   :  { %v84_v11 = vshrl.u32 %v83_v9, 16 }
  0x44   :  { %387 = vmatpush3.bf16.msra.mxu1 %v422_v17  ;;  %p502_p0 = pnand %p501_p13, %p495_p10 }
  0x45   :  { %v85_v13 = vxor.u32 %v84_v11, %v83_v9  ;;  %388 = vmatprep.subr.bf16.mxu1 %v527_v2 }
  0x47   :  { %v86_v15 = vmul.u32 2146121005, %v85_v13 }
  0x48   :  { %389 = vmatpush3.bf16.msra.mxu1 %v423_v20 }
  0x49   :  { %v87_v16 = vshrl.u32 %v86_v15, 15  ;;  %390 = vmatprep.subr.bf16.mxu1 %v527_v2 }
  0x4b   :  { %v88_v18 = vxor.u32 %v87_v16, %v86_v15 }
  0x4c   :  { %391 = vmatpush3.bf16.msra.mxu1 %v424_v23 }
  0x4d   :  { %v89_v19 = vmul.u32 2221713035, %v88_v18  ;;  %392 = vmatprep.subr.bf16.mxu1 %v527_v2 }
  0x4f   :  { %v90_v21 = vshrl.u32 %v89_v19, 16 }
  0x50   :  { %393 = vmatpush3.bf16.msra.mxu1 %v425_v26 }
  0x51   :  { %v91_v22 = vxor.u32 %v90_v21, %v89_v19  ;;  %394 = vmatprep.subr.bf16.mxu1 %v527_v2 }
  0x53   :  { %v92_v25 = vshrl.u32 %v91_v22, 8 }
  0x54   :  { %395 = vmatpush3.bf16.msra.mxu1 %v426_v29 }
  0x55   :  { %vm93_vm1 = vcmp.ge.u32.totalorder %v92_v25, 13421772  ;;  %396 = vmatprep.subr.bf16.mxu1 %v527_v2 }
  0x56   :  { %v94_v27 = vsel %vm93_vm1, %v71_v24, 0.0 }
  0x57   :  { %v95_v28 = vpack.c.bf16 %v94_v27, %v94_v27 }
  0x58   :  { %397 = vmatpush3.bf16.msra.mxu1 %v427_v30 }
  0x59   :  { %379 = vmatmul.mubr.msk.bf16.vlgmr.msra.gmra.mrb[0].mxu0 %vm119_vm2, %v95_v28 }
  0x5a   :  { %404 = vmatprep.mubr.msk.bf16.mxu0 %vm528_vm0, %v527_v2 }
  0xbe   :  { %v283_v51 = vpop.permute.xlu0 %282 }
  0xbf   :  { %v288_v52 = vrot.slane %v283_v51, %v287_v50 }
 0x12c   :  { %v157_v32 = vpop.f32.mrb[0].mxu0 }
 0x12d   :  { %v158_v33 = vadd.f32 %v347_v31, %v157_v32  ;;  %v380_v34 = vpop.f32.mrb[1].mxu0 }
 0x12e   :  { %v160_v35 = vpop.f32.mrb[2].mxu0 }
 0x12f   :  { %v163_v36 = vmax.f32 %v158_v33, 0.0  ;;  %v381_v37 = vpop.f32.mrb[3].mxu0 }
 0x131   :  { %v164_v38 = vpack.c.bf16 %v163_v36, %v163_v36 }
 0x133   :  { %399 = vmatmul.mubr.bf16.vlgmr.msra.gmra.mrb[0].mxu1 %v164_v38 }
 0x206   :  { %v270_v42 = vpop.f32.mrb[0].mxu1 }
 0x207   :  { %v271_v43 = vadd.f32 %v351_v41, %v270_v42  ;;  %v400_v44 = vpop.f32.mrb[1].mxu1 }
 0x208   :  { %v273_v45 = vpop.f32.mrb[2].mxu1 }
 0x209   :  { %v276_v46 = vmax.f32 %v271_v43, 0.0  ;;  %v401_v47 = vpop.f32.mrb[3].mxu1 }
 0x20b   :  { %v277_v48 = vpack.c.bf16 %v276_v46, %v276_v46 }
 0x20d   :  { %403 = vmatpush3.bf16.xpose.msra.mxu0 %v277_v48 }
 0x214   :  { %405 = vmatmul.mubr.bf16.vlgmr.msra.gmra.mrb[4].mxu0 %v278_v49 }
 0x2e7   :  { %v323_v53 = vpop.f32.mrb[4].mxu0 }
 0x2e8   :  { %v324_v54 = vadd.f32 %v323_v53, %v288_v52  ;;  %v406_v55 = vpop.f32.mrb[5].mxu0 }
 0x2e9   :  { %v326_v56 = vpop.f32.mrb[6].mxu0 }
 0x2ea   :  { %v407_v57 = vpop.f32.mrb[7].mxu0  ;;  %330 = vst.msk [vmem:[#allocation11] sm:$0x1] %vm329_vm3, %v324_v54 }
 0x2eb   :  { %505 = shalt.err (!%p502_p0)
}
 0x2ec   :  { %s506_s28 = scalar_lea.hbm %s660_s8, 16 }
 0x2ed   :  { %p507_p1 = scmp.ne.s32.totalorder %s660_s8, %s506_s28  ;;  %p510_p2 = scmp.lt.u32.totalorder %s506_s28, %s660_s8 }
 0x2ef   :  { %p512_p3 = pnand %p510_p2, %p507_p1 }
 0x2f1   :  { %515 = shalt.err (!%p512_p3)
}
 0x2f2   :  { %340 = dma.vmem_to_hbm [thread:$0]  %s338_s25, 16, %s660_s8, [#allocation7]  }
 0x2f3   :  { %520 = dma.done.wait [#allocation7], 16  }
 0x2f4   :  { %521 = vsyncadd [#allocation7], 4294967280 }
 0x2f5   :  { %344 = vsyncpa [#allocation6], 1 }
 0x2f6   :  { %345 = vsyncpa [#allocation9], 1 }
 0x2f7   :  { %346 = vsyncpa [#allocation7], 1 }

</bundles_post_ra>
